<compile_context>
chip_gen: v7x
topology: tpu7x:2x2x1
jax: 0.10.0
libtpu: 0.0.40
codegen_flags: <defaults>
</compile_context>

<pallas_src>
import functools

import jax
import jax.numpy as jnp
from jax.experimental import pallas as pl
from jax.experimental.pallas import tpu as pltpu

_EPS = 1e-8  # matches l2norm(): y / (||y|| + eps), eps added after the sqrt


def _round_up(x, m):
    return ((x + m - 1) // m) * m


def _pick_tile(dim, preferred, quantum):
    """Largest multiple of `quantum` dividing `dim`, capped at `preferred`; else `dim`."""
    t = min(preferred, (dim // quantum) * quantum)
    while t >= quantum:
        if dim % t == 0:
            return t
        t -= quantum
    return dim


def _vmem_budget_bytes():
    """Usable VMEM per core (generation aware), minus ~15% headroom for Mosaic scratch."""
    try:
        cap = int(pltpu.get_tpu_info().vmem_capacity_bytes)
    except Exception:  # conservative default: v7x per-TC VMEM
        cap = 64 << 20
    return max(int(cap * 0.85), 32 << 20)


def _l2norm_epilogue(y):
    norm = jnp.sqrt(jnp.sum(y * y, axis=-1, keepdims=True)) + _EPS
    # Reciprocal on the EUP (otherwise idle); keeps VALU slots free.
    return y * pl.reciprocal(norm, approx=True)


def _fused_kernel(x_ref, w_ref, b_ref, o_ref, *, normalize):
    """One M tile, full K in a single MXU pass: linear + bias + (optional) L2 norm."""
    y = jnp.dot(x_ref[...], w_ref[...], preferred_element_type=jnp.float32)
    y = y + b_ref[...].astype(jnp.float32)
    if normalize:
        y = _l2norm_epilogue(y)
    o_ref[...] = y.astype(o_ref.dtype)


def _ktiled_kernel(x_ref, w_ref, b_ref, o_ref, acc_ref, *, normalize):
    """K-reduction fallback: accumulate in a VMEM f32 scratch; write output on last K step."""
    k = pl.program_id(1)

    @pl.when(k == 0)
    def _():
        acc_ref[...] = jnp.broadcast_to(b_ref[...].astype(jnp.float32), acc_ref.shape)

    acc_ref[...] += jnp.dot(x_ref[...], w_ref[...], preferred_element_type=jnp.float32)

    @pl.when(k == pl.num_programs(1) - 1)
    def _():
        y = acc_ref[...]
        if normalize:
            y = _l2norm_epilogue(y)
        o_ref[...] = y.astype(o_ref.dtype)


def _run_fused_grid(x, w_t, bias2d, out_dtype, tm, normalize, vmem_limit, single_buffer_w):
    Mp, K = x.shape
    _, N = w_t.shape
    resident_kwargs = dict(pipeline_mode=pl.Buffered(1)) if single_buffer_w else {}
    return pl.pallas_call(
        functools.partial(_fused_kernel, normalize=normalize),
        out_shape=jax.ShapeDtypeStruct((Mp, N), out_dtype),
        grid_spec=pltpu.PrefetchScalarGridSpec(
            num_scalar_prefetch=0,
            grid=(Mp // tm,),
            in_specs=[
                pl.BlockSpec((tm, K), lambda i: (i, 0)),                       # x tile
                pl.BlockSpec((K, N), lambda i: (0, 0), **resident_kwargs),     # W resident
                pl.BlockSpec((1, N), lambda i: (0, 0), **resident_kwargs),     # bias resident
            ],
            out_specs=pl.BlockSpec((tm, N), lambda i: (i, 0)),
        ),
        compiler_params=pltpu.CompilerParams(
            dimension_semantics=("parallel",),          # shards M tiles across TCs (v7x)
            vmem_limit_bytes=vmem_limit,
        ),
    )(x, w_t, bias2d)


def _run_ktiled(x, w_t, bias2d, out_dtype, tm, tk, normalize, vmem_limit, single_buffer_b):
    Mp, Kp = x.shape
    _, N = w_t.shape
    resident_kwargs = dict(pipeline_mode=pl.Buffered(1)) if single_buffer_b else {}
    return pl.pallas_call(
        functools.partial(_ktiled_kernel, normalize=normalize),
        out_shape=jax.ShapeDtypeStruct((Mp, N), out_dtype),
        grid_spec=pltpu.PrefetchScalarGridSpec(
            num_scalar_prefetch=0,
            grid=(Mp // tm, Kp // tk),                   # reduction axis last
            in_specs=[
                pl.BlockSpec((tm, tk), lambda i, k: (i, k)),
                pl.BlockSpec((tk, N), lambda i, k: (k, 0)),
                pl.BlockSpec((1, N), lambda i, k: (0, 0), **resident_kwargs),
            ],
            out_specs=pl.BlockSpec((tm, N), lambda i, k: (i, 0)),
            scratch_shapes=[pltpu.VMEM((tm, N), jnp.float32)],   # f32 accumulator
        ),
        compiler_params=pltpu.CompilerParams(
            dimension_semantics=("parallel", "arbitrary"),
            vmem_limit_bytes=vmem_limit,
        ),
    )(x, w_t, bias2d)


def imgfc_forward(images, w_t, bias, *, no_imgnorm=False, compute_dtype=jnp.bfloat16,
                  tm=None, tk=None):
    """images: (M, img_dim), w_t: (img_dim, emb_dim), bias: (emb_dim,).

    compute_dtype: matmul operand dtype (default bf16: MXU-native on v5e/v6e/v7x);
    accumulation and epilogue are always f32; output dtype matches `images`.
    """
    M, K = images.shape
    Kw, N = w_t.shape
    assert K == Kw and bias.shape == (N,)

    out_dtype = images.dtype
    if compute_dtype is not None and images.dtype != compute_dtype:
        images = images.astype(compute_dtype)
    if compute_dtype is not None and w_t.dtype != compute_dtype:
        w_t = w_t.astype(compute_dtype)
    bias2d = bias.reshape(1, N).astype(jnp.float32)

    x_bytes = jnp.dtype(images.dtype).itemsize
    w_bytes = jnp.dtype(w_t.dtype).itemsize
    o_bytes = jnp.dtype(out_dtype).itemsize
    normalize = not no_imgnorm

    budget = _vmem_budget_bytes()
    qm = 16 if x_bytes == 2 else 8          # sublane quantum: bf16 packs 16 rows / vreg

    # --- Path 1: tiny problem -> single whole-array block, no grid, no pipeline. ---
    total_bytes = M * K * x_bytes + K * N * w_bytes + M * N * (o_bytes + 4) + N * 4
    if M <= 128 and total_bytes <= (8 << 20):
        return pl.pallas_call(
            functools.partial(_fused_kernel, normalize=normalize),
            out_shape=jax.ShapeDtypeStruct((M, N), out_dtype),
        )(images, w_t, bias2d)

    # --- Plan tm: multiples of the sublane quantum; >= 2 tiles whenever M > 128
    #     (keeps both v7x TensorCores busy via the "parallel" M axis). ---
    if tm is None:
        if M <= 128:
            tm = _round_up(max(M, qm), qm)
        elif M <= 512:
            tm = min(256, _round_up(pl.cdiv(M, 2), qm))
        else:
            tm = 256
    tm = max(qm, _round_up(tm, qm))

    # --- Path 2: M-tiled, full-K block; W + bias resident in VMEM (constant index_map). ---
    def fullk_bytes(t, w_copies):
        return (w_copies * K * N * w_bytes + N * 4            # weight slab(s) + bias
                + 2 * t * K * x_bytes                          # double-buffered x tile
                + 2 * t * N * o_bytes + t * N * 4)             # out tile + f32 intermediate

    want_ktiled = tk is not None and tk < K
    if not want_ktiled and fullk_bytes(tm, 1) <= budget:
        Mp = _round_up(M, tm)
        x = images if Mp == M else jnp.pad(images, ((0, Mp - M), (0, 0)))
        out = None
        try:
            out = _run_fused_grid(x, w_t, bias2d, out_dtype, tm, normalize, budget, True)
        except Exception:
            # Buffered(1) unsupported -> retry with default double buffering if it fits.
            if fullk_bytes(tm, 2) <= budget:
                out = _run_fused_grid(x, w_t, bias2d, out_dtype, tm, normalize, budget, False)
        if out is not None:
            return out[:M] if Mp != M else out

    # --- Path 3: weights too large for a resident slab -> tile K (reduction axis last). ---
    Kp = _round_up(K, 128)
    if tk is None:
        tk = _pick_tile(Kp, 512, 128)
    tk = max(128, (tk // 128) * 128)
    if Kp % tk != 0:
        tk = _pick_tile(Kp, tk, 128)

    def ktiled_bytes(t):
        return (2 * (t * tk * x_bytes + tk * N * w_bytes)      # double-buffered x / W tiles
                + N * 4 + t * N * 4 + 2 * t * N * o_bytes)     # bias + f32 acc + out tile

    # Grow tm (up to 512, up to padded M) to cut the number of full-weight HBM re-streams.
    tm_cap = min(512, _round_up(M, qm))
    while tm * 2 <= tm_cap and ktiled_bytes(tm * 2) <= budget:
        tm *= 2
    while tm > qm and ktiled_bytes(tm) > budget:
        tm = max(qm, _round_up(tm // 2, qm))

    Mp = _round_up(M, tm)
    x = images
    if Mp != M or Kp != K:
        x = jnp.pad(images, ((0, Mp - M), (0, Kp - K)))
    w = w_t if Kp == K else jnp.pad(w_t, ((0, Kp - K), (0, 0)))

    try:
        out = _run_ktiled(x, w, bias2d, out_dtype, tm, tk, normalize, budget, True)
    except Exception:
        out = _run_ktiled(x, w, bias2d, out_dtype, tm, tk, normalize, budget, False)
    return out[:M] if Mp != M else out


def imgfc_reference(images, w_t, bias, *, no_imgnorm=False):
    y = images.astype(jnp.float32) @ w_t.astype(jnp.float32) + bias
    if no_imgnorm:
        return y
    norm = jnp.sqrt(jnp.sum(y * y, axis=-1, keepdims=True)) + _EPS
    return y / norm


if __name__ == "__main__":
    key = jax.random.PRNGKey(0)

    def make_inputs(k, M, img_dim, emb_dim):
        kx, kw, kb = jax.random.split(k, 3)
        x = jax.random.normal(kx, (M, img_dim), dtype=jnp.float32)
        bound = 1.0 / (img_dim ** 0.5)
        w = jax.random.uniform(kw, (emb_dim, img_dim), jnp.float32, -bound, bound)  # torch layout
        b = jax.random.uniform(kb, (emb_dim,), jnp.float32, -bound, bound)
        return x, w.T, b

    k1, k2 = jax.random.split(key)

    # 1) Tiny shapes -> single-block (no-grid) path, default bf16 MXU compute.
    x, w_t, b = make_inputs(k1, 16, 64, 32)
    ref = imgfc_reference(x, w_t, b)
    out = jax.block_until_ready(imgfc_forward(x, w_t, b))
    assert jnp.allclose(out, ref, atol=2e-2, rtol=2e-2), "tiny bf16 case mismatch"

    # no_imgnorm variant (f32 compute for a tight tolerance).
    out_nn = jax.block_until_ready(imgfc_forward(x, w_t, b, no_imgnorm=True, compute_dtype=None))
    ref_nn = imgfc_reference(x, w_t, b, no_imgnorm=True)
    assert jnp.allclose(out_nn, ref_nn, atol=2e-3, rtol=2e-3), "no_imgnorm case mismatch"

    # 2) M-tiled path with resident full-K weights (grid of >=2 M tiles).
    x, w_t, b = make_inputs(k2, 320, 512, 256)
    ref = imgfc_reference(x, w_t, b)
    out_bf = jax.block_until_ready(imgfc_forward(x, w_t, b))                    # default bf16
    assert jnp.allclose(out_bf, ref, atol=2e-2, rtol=2e-2), "tiled bf16 case mismatch"
    out_f32 = jax.block_until_ready(imgfc_forward(x, w_t, b, compute_dtype=None))
    assert jnp.allclose(out_f32, ref, atol=2e-3, rtol=2e-3), "tiled f32 case mismatch"

    # 3) K-tiled fallback path (forced via explicit tk < K), f32 compute.
    out_kt = jax.block_until_ready(imgfc_forward(x, w_t, b, compute_dtype=None, tk=128))
    assert jnp.allclose(out_kt, ref, atol=2e-3, rtol=2e-3), "K-tiled case mismatch"

    print("KERNEL_OK")
</pallas_src>

<mosaic_0001>
module attributes {stable_mosaic.version = 11 : i64} {
  func.func @_fused_kernel(%arg0: memref<16x64xbf16, #tpu.memory_space<vmem>>, %arg1: memref<64x32xbf16, #tpu.memory_space<vmem>>, %arg2: memref<1x32xf32, #tpu.memory_space<vmem>>, %arg3: memref<16x32xf32, #tpu.memory_space<vmem>>) attributes {dimension_semantics = [], scalar_prefetch = 0 : i64, scratch_operands = 0 : i64, tpu.core_type = #tpu.core_type<tc>} {
    %c0 = arith.constant 0 : index
    %c0_0 = arith.constant 0 : index
    %0 = vector.load %arg0[%c0, %c0_0] : memref<16x64xbf16, #tpu.memory_space<vmem>>, vector<16x64xbf16>
    %c0_1 = arith.constant 0 : index
    %c0_2 = arith.constant 0 : index
    %1 = vector.load %arg1[%c0_1, %c0_2] : memref<64x32xbf16, #tpu.memory_space<vmem>>, vector<64x32xbf16>
    %cst = arith.constant dense<0.000000e+00> : vector<16x32xf32>
    %2 = tpu.matmul %0, %1, %cst {dimension_numbers = #tpu.dot_dimension_numbers<[1], [0], [0], [1], [0, 0, 1, 1], [], []>} : vector<16x64xbf16>, vector<64x32xbf16>, vector<16x32xf32> -> vector<16x32xf32>
    %c0_3 = arith.constant 0 : index
    %c0_4 = arith.constant 0 : index
    %3 = vector.load %arg2[%c0_3, %c0_4] : memref<1x32xf32, #tpu.memory_space<vmem>>, vector<1x32xf32>
    %4 = vector.broadcast %3 : vector<1x32xf32> to vector<16x32xf32>
    %5 = arith.addf %2, %4 : vector<16x32xf32>
    %6 = arith.mulf %5, %5 : vector<16x32xf32>
    %cst_5 = arith.constant dense<0.000000e+00> : vector<16xf32>
    %7 = vector.multi_reduction <add>, %6, %cst_5 [1] : vector<16x32xf32> to vector<16xf32>
    %8 = vector.shape_cast %7 : vector<16xf32> to vector<16x1xf32>
    %9 = math.sqrt %8 : vector<16x1xf32>
    %cst_6 = arith.constant 9.99999993E-9 : f32
    %10 = vector.broadcast %cst_6 : f32 to vector<16x1xf32>
    %11 = arith.addf %9, %10 : vector<16x1xf32>
    %12 = tpu.reciprocal %11 {approx = true} : vector<16x1xf32> -> vector<16x1xf32>
    %13 = vector.broadcast %12 : vector<16x1xf32> to vector<16x32xf32>
    %14 = arith.mulf %5, %13 : vector<16x32xf32>
    %c0_7 = arith.constant 0 : index
    %c0_8 = arith.constant 0 : index
    %15 = vector.load %arg3[%c0_7, %c0_8] : memref<16x32xf32, #tpu.memory_space<vmem>>, vector<16x32xf32>
    tpu.vector_store %arg3[%c0_7, %c0_8], %14 {strides = array<i32>} : memref<16x32xf32, #tpu.memory_space<vmem>>, vector<16x32xf32>,
    return
  }
}

</mosaic_0001>

<bundles_post_ra>
// kernel: tpu_custom_call.1
= control target key start
LH: loop header
LB: loop body
LE: loop exit
PB: predicated region body
PF: predicated region fallthrough
CT: control target
= control target key end

     0   :  { %v220_v1 = vmov 0.0   ;;  %vm221_vm0 = vmmov 0   ;;  %s279_s0 = inlined_call_operand.vmem [shape: bf16[16,64], index: 0, kind: input, shape index: {}]   ;;  %s280_s1 = inlined_call_operand.vmem [shape: bf16[64,32], index: 1, kind: input, shape index: {}]   ;;  %s281_s2 = inlined_call_operand.vmem [shape: f32[1,32], index: 2, kind: input, shape index: {}]   ;;  %s282_s3 = inlined_call_operand.hbm [shape: f32[16,32], index: 3, kind: output, shape index: {}]  }
   0x1   :  { %v183_v0 = vld [vmem:[%s280_s1] sm:$0xff]   ;;  %166 = vmatprep.subr.bf16.mxu0 %v220_v1  ;;  %v184_v2 = vld [vmem:[%s280_s1 + $0x8] sm:$0xff]   ;;  %174 = vmatprep.mubr.msk.bf16.mxu0 %vm221_vm0, %v220_v1 }
   0x2   :  { %167 = vmatpush3.bf16.msra.mxu0 %v183_v0 }
   0x3   :  { %168 = vmatprep.subr.bf16.mxu0 %v220_v1 }
   0x4   :  { %8 = vsyncpa [#allocation3], 0  ;;  %v185_v3 = vld [vmem:[%s280_s1 + $0x10] sm:$0xff]   ;;  %v186_v4 = vld [vmem:[%s280_s1 + $0x18] sm:$0xff]   ;;  %vm62_vm1 = vcmask 523264   ;;  %vm109_vm2 = vcmask 261120  }
   0x5   :  { %v187_v5 = vld [vmem:[%s279_s0] sm:$0xff]   ;;  %s222_s0 = smov [#allocation2]  }
   0x6   :  { %169 = vmatpush3.bf16.msra.mxu0 %v184_v2  ;;  %v154_v6 = vld [vmem:[%s281_s2] ss:$0 sm:$0xff]  ;;  %s143_s1 = sshll.u32 %s222_s0, 4  ;;  %s144_s1 = int_to_ptr.vmem [resolvable:$true] %s143_s1 }
   0x7   :  { %170 = vmatprep.subr.bf16.mxu0 %v220_v1  ;;  %s196_s2 = scalar_lea.vmem %s144_s1, 256  ;;  %p201_p1 = scmp.lt.s32.totalorder %s144_s1, %s144_s1 }
   0x8   :  { %p197_p0 = scmp.ne.s32.totalorder %s144_s1, %s196_s2  ;;  %p202_p2 = scmp.lt.s32.totalorder %s196_s2, %s196_s2 }
   0xa   :  { %171 = vmatpush3.bf16.msra.mxu0 %v185_v3  ;;  %p203_p3 = por %p202_p2, %p201_p1 }
   0xb   :  { %172 = vmatprep.subr.bf16.mxu0 %v220_v1 }
   0xc   :  { %p204_p4 = pnand %p203_p3, %p197_p0 }
   0xe   :  { %173 = vmatpush3.bf16.msra.mxu0 %v186_v4 }
  0x11   :  { %175 = vmatmul.mubr.msk.bf16.vlgmr.msra.gmra.mrb[0].mxu0 %vm62_vm1, %v187_v5 }
  0xe4   :  { %v100_v7 = vpop.f32.mrb[0].mxu0 }
  0xe5   :  { %v101_v8 = vadd.f32 %v154_v6, %v100_v7  ;;  %v176_v9 = vpop.f32.mrb[1].mxu0 }
  0xe6   :  { %v103_v10 = vpop.f32.mrb[2].mxu0 }
  0xe7   :  { %v104_v11 = vadd.f32 %v154_v6, %v103_v10  ;;  %v177_v12 = vpop.f32.mrb[3].mxu0  ;;  %v107_v13 = vmul.f32 %v101_v8, %v101_v8 }
  0xe9   :  { %v110_v14 = vsel %vm109_vm2, %v107_v13, 0.0  ;;  %v108_v15 = vmul.f32 %v104_v11, %v104_v11 }
  0xea   :  { %111 = vadd.xlane.f32.xlu0 %v110_v14 }
  0xeb   :  { %v113_v16 = vsel %vm109_vm2, %v108_v15, 0.0 }
  0xee   :  { %114 = vadd.xlane.f32.xlu0 %v113_v16 }
 0x177   :  { %v112_v17 = vpop.xlane.xlu0 %111 }
 0x178   :  { %188 = vrsqrt.f32 %v112_v17  ;;  %vm118_vm3 = vcmp.eq.f32.partialorder %v112_v17, inf  ;;  %v121_v21 = vand.u32 2147483648, %v112_v17  ;;  %vm120_vm4 = vcmp.eq.f32.partialorder %v112_v17, 0.0 }
 0x17b   :  { %v115_v18 = vpop.xlane.xlu0 %114 }
 0x17c   :  { %190 = vrsqrt.f32 %v115_v18  ;;  %vm125_vm5 = vcmp.eq.f32.partialorder %v115_v18, inf  ;;  %v128_v27 = vand.u32 2147483648, %v115_v18  ;;  %vm127_vm6 = vcmp.eq.f32.partialorder %v115_v18, 0.0 }
 0x182   :  { %v189_v19 = vpop.eup %188 }
 0x183   :  { %v117_v20 = vmul.f32 %v189_v19, %v112_v17 }
 0x185   :  { %v119_v22 = vsel %vm118_vm3, %v112_v17, %v117_v20 }
 0x186   :  { %v191_v23 = vpop.eup %190  ;;  %v122_v24 = vsel %vm120_vm4, %v121_v21, %v119_v22 }
 0x187   :  { %v130_v25 = vadd.f32 1e-08, %v122_v24  ;;  %v124_v26 = vmul.f32 %v191_v23, %v115_v18 }
 0x189   :  { %192 = vrcp.f32 %v130_v25  ;;  %v126_v28 = vsel %vm125_vm5, %v115_v18, %v124_v26 }
 0x18a   :  { %v129_v29 = vsel %vm127_vm6, %v128_v27, %v126_v28 }
 0x18b   :  { %v131_v30 = vadd.f32 1e-08, %v129_v29 }
 0x18d   :  { %194 = vrcp.f32 %v131_v30 }
 0x193   :  { %v193_v31 = vpop.eup %192 }
 0x194   :  { %v134_v32 = vmul.f32 %v193_v31, %v101_v8 }
 0x196   :  { %136 = vst.msk [vmem:[#allocation2] sm:$0xff] %vm109_vm2, %v134_v32 }
 0x197   :  { %v195_v33 = vpop.eup %194 }
 0x198   :  { %v135_v34 = vmul.f32 %v195_v33, %v104_v11 }
 0x19a   :  { %137 = vst.msk [vmem:[#allocation2 + $0x8] sm:$0xff] %vm109_vm2, %v135_v34 }
 0x19b   :  { %207 = shalt.err (!%p204_p4)
}
 0x19c   :  { %s208_s26 = scalar_lea.hbm %s282_s3, 256 }
 0x19d   :  { %p209_p5 = scmp.ne.s32.totalorder %s282_s3, %s208_s26  ;;  %p212_p6 = scmp.lt.u32.totalorder %s208_s26, %s282_s3 }
 0x19f   :  { %p214_p7 = pnand %p212_p6, %p209_p5 }
 0x1a1   :  { %217 = shalt.err (!%p214_p7)
}
 0x1a2   :  { %s223_s4 = smov 128   ;;  %s224_s5 = smov 8  }
 0x1a3   :  { %149 = dma.vmem_to_hbm [thread:$0]  %s144_s1, 256, %s282_s3, [#allocation3], %s223_s4, %s223_s4, %s224_s5  }
 0x1a4   :  { %218 = dma.done.wait [#allocation3], 256  }
 0x1a5   :  { %219 = vsyncadd [#allocation3], 4294967040 }
 0x1a6   :  { %153 = vsyncpa [#allocation3], 1 }

</bundles_post_ra>
